<compile_context>
chip_gen: v5e
topology: v5e:2x2
jax: 0.10.0
libtpu: 0.0.40
codegen_flags: <defaults>
</compile_context>

<pallas_src>
import functools

import jax
import jax.numpy as jnp
from jax.experimental import pallas as pl
from jax.experimental.pallas import tpu as pltpu

LANES = 128
SUBLANES = 8


def _aeloss_kernel(o_ref, t_ref, l1_out_ref, l2_out_ref, l1_acc, l2_acc, *,
                   row_tile, rows, tiles_per_split, first_masked_tile,
                   needs_mask):
    h = pl.program_id(0)          # TensorCore split (parallel axis)
    i = pl.program_id(1)          # row-tile index within the split (reduction)

    @pl.when(i == 0)
    def _init():
        l1_acc[...] = jnp.zeros_like(l1_acc)
        l2_acc[...] = jnp.zeros_like(l2_acc)

    diff = o_ref[...].astype(jnp.float32) - t_ref[...].astype(jnp.float32)

    def accumulate(d):
        # (row_tile, 128) -> (row_tile//8, 8, 128): leading-axis sum is pure
        # cross-vreg VALU adds; the accumulators stay a single vreg each.
        d3 = d.reshape(row_tile // SUBLANES, SUBLANES, LANES)
        l1_acc[...] += jnp.sum(jnp.abs(d3), axis=0)
        l2_acc[...] += jnp.sum(d3 * d3, axis=0)

    if needs_mask:
        tile = h * tiles_per_split + i          # logical (unclamped) tile id
        is_masked_tile = tile >= first_masked_tile

        @pl.when(jnp.logical_not(is_masked_tile))
        def _interior():                        # fast path: no mask ops
            accumulate(diff)

        @pl.when(is_masked_tile)
        def _tail():
            # Row-only mask: covers the ragged last row tile and any fully
            # masked phantom tile of the 2-way split.  Must stay a select so
            # stale/NaN VMEM rows can never poison the sums.
            row_ids = jax.lax.broadcasted_iota(jnp.int32, diff.shape, 0)
            valid = (tile * row_tile + row_ids) < rows
            accumulate(jnp.where(valid, diff, 0.0))
    else:
        accumulate(diff)

    @pl.when(i == pl.num_programs(1) - 1)
    def _finalize():
        # Emit the raw (8, 128) partial sums; the wrapper does the (tiny)
        # cross-lane reduce, the /N and the lambda weighting.
        l1_out_ref[...] = l1_acc[...]
        l2_out_ref[...] = l2_acc[...]


def ae_loss(outputs, targets, lambda1, lambda2, *, _row_tile_cap=None):
    """lambda1 * mean(|o - t|) + lambda2 * mean((o - t)**2), 'mean' reduction."""
    assert outputs.shape == targets.shape
    n_elems = int(outputs.size)
    lam1 = jnp.float32(lambda1)
    lam2 = jnp.float32(lambda2)
    if n_elems == 0:
        return jnp.float32(0.0)
    inv_n = jnp.float32(1.0 / n_elems)

    o_flat = jnp.ravel(outputs)     # contiguous reshape: no HBM copy
    t_flat = jnp.ravel(targets)

    itemsize = jnp.dtype(outputs.dtype).itemsize
    # Row alignment that keeps (row_tile, 128) blocks on native packed tiles:
    # f32 -> 8 rows, bf16 -> 16, int8/fp8 -> 32.
    row_align = max(SUBLANES, SUBLANES * (4 // max(1, itemsize)))
    chunk = LANES * row_align
    main_elems = (n_elems // chunk) * chunk
    rows = main_elems // LANES                  # always a multiple of row_align

    # Ragged tail (< chunk elements): tiny plain-JAX reduction, no jnp.pad copy.
    tail_l1 = jnp.float32(0.0)
    tail_l2 = jnp.float32(0.0)
    if main_elems < n_elems:
        td = (o_flat[main_elems:].astype(jnp.float32)
              - t_flat[main_elems:].astype(jnp.float32))
        tail_l1 = jnp.sum(jnp.abs(td))
        tail_l2 = jnp.sum(td * td)

    if rows == 0:                               # whole tensor fits in the tail
        return lam1 * tail_l1 * inv_n + lam2 * tail_l2 * inv_n

    o2d = o_flat[:main_elems].reshape(rows, LANES)
    t2d = t_flat[:main_elems].reshape(rows, LANES)

    # Device-dependent knobs (fall back to the conservative single-core path).
    try:
        kind = jax.devices()[0].device_kind.lower()
    except Exception:
        kind = ""
    is_v7 = "v7" in kind
    target_block_bytes = (4 << 20) if is_v7 else (2 << 20)   # per input block

    row_tile_max = max(row_align,
                       (target_block_bytes // (LANES * itemsize))
                       // row_align * row_align)
    if _row_tile_cap is not None:               # test hook for the masked path
        row_tile_max = min(row_tile_max, max(row_align, _row_tile_cap))
    row_tile = min(row_tile_max, rows)          # multiple of row_align (and 8)
    n_tiles = pl.cdiv(rows, row_tile)

    # 2-way TensorCore split only where it pays (v7x, several tiles per core).
    num_splits = 2 if (is_v7 and n_tiles >= 8) else 1
    tiles_per_split = pl.cdiv(n_tiles, num_splits)

    ragged_rows = (rows % row_tile) != 0
    has_phantom = (num_splits * tiles_per_split) != n_tiles
    needs_mask = ragged_rows or has_phantom
    first_masked_tile = (rows // row_tile) if ragged_rows else n_tiles

    def in_map(h, i):
        # Clamp so the auto-DMA stays in bounds; logically out-of-range tiles
        # are zeroed inside the kernel by the row mask.
        return (jnp.minimum(h * tiles_per_split + i, n_tiles - 1), 0)

    kernel = functools.partial(
        _aeloss_kernel,
        row_tile=row_tile, rows=rows, tiles_per_split=tiles_per_split,
        first_masked_tile=first_masked_tile, needs_mask=needs_mask)

    out_shape = jax.ShapeDtypeStruct((num_splits * SUBLANES, LANES),
                                     jnp.float32)

    l1_part, l2_part = pl.pallas_call(
        kernel,
        out_shape=(out_shape, out_shape),
        grid=(num_splits, tiles_per_split),
        in_specs=[
            pl.BlockSpec((row_tile, LANES), in_map),
            pl.BlockSpec((row_tile, LANES), in_map),
        ],
        out_specs=(
            pl.BlockSpec((SUBLANES, LANES), lambda h, i: (h, 0)),
            pl.BlockSpec((SUBLANES, LANES), lambda h, i: (h, 0)),
        ),
        scratch_shapes=[
            pltpu.VMEM((SUBLANES, LANES), jnp.float32),
            pltpu.VMEM((SUBLANES, LANES), jnp.float32),
        ],
        compiler_params=pltpu.CompilerParams(
            dimension_semantics=("parallel", "arbitrary")),
        cost_estimate=pl.CostEstimate(
            flops=5 * n_elems, transcendentals=0,
            bytes_accessed=2 * n_elems * itemsize),
    )(o2d, t2d)

    l1_sum = jnp.sum(l1_part) + tail_l1
    l2_sum = jnp.sum(l2_part) + tail_l2
    return lam1 * l1_sum * inv_n + lam2 * l2_sum * inv_n


def _reference(outputs, targets, lambda1, lambda2):
    d = outputs.astype(jnp.float32) - targets.astype(jnp.float32)
    return lambda1 * jnp.mean(jnp.abs(d)) + lambda2 * jnp.mean(d * d)


if __name__ == "__main__":
    key = jax.random.PRNGKey(0)
    lambda1, lambda2 = 0.5, 1.5

    # Primary check: small NCHW autoencoder-style tensors.
    k1, k2, k3, k4 = jax.random.split(key, 4)
    outputs = jax.random.normal(k1, (2, 4, 16, 16), dtype=jnp.float32)
    targets = jax.random.normal(k2, (2, 4, 16, 16), dtype=jnp.float32)
    loss = jax.block_until_ready(ae_loss(outputs, targets, lambda1, lambda2))
    ref = _reference(outputs, targets, lambda1, lambda2)
    assert jnp.allclose(loss, ref, rtol=1e-5, atol=1e-6), (loss, ref)

    # Ragged size (exercises the plain-JAX tail path).
    o2 = jax.random.normal(k3, (3, 5, 7, 11), dtype=jnp.float32)
    t2 = jax.random.normal(k4, (3, 5, 7, 11), dtype=jnp.float32)
    loss2 = jax.block_until_ready(ae_loss(o2, t2, lambda1, lambda2))
    ref2 = _reference(o2, t2, lambda1, lambda2)
    assert jnp.allclose(loss2, ref2, rtol=1e-5, atol=1e-6), (loss2, ref2)

    # Multi-tile + ragged last tile (exercises the gated in-kernel row mask).
    o3 = jax.random.normal(k1, (2, 4, 16, 24), dtype=jnp.float32)
    t3 = jax.random.normal(k2, (2, 4, 16, 24), dtype=jnp.float32)
    loss3 = jax.block_until_ready(
        ae_loss(o3, t3, lambda1, lambda2, _row_tile_cap=16))
    ref3 = _reference(o3, t3, lambda1, lambda2)
    assert jnp.allclose(loss3, ref3, rtol=1e-5, atol=1e-6), (loss3, ref3)

    print("KERNEL_OK")
</pallas_src>

<mosaic_0001>
module attributes {stable_mosaic.version = 11 : i64} {
  func.func @_aeloss_kernel(%arg0: i32, %arg1: i32, %arg2: memref<16x128xf32, #tpu.memory_space<vmem>>, %arg3: memref<16x128xf32, #tpu.memory_space<vmem>>, %arg4: memref<8x128xf32, #tpu.memory_space<vmem>>, %arg5: memref<8x128xf32, #tpu.memory_space<vmem>>, %arg6: memref<8x128xf32, #tpu.memory_space<vmem>>, %arg7: memref<8x128xf32, #tpu.memory_space<vmem>>) attributes {dimension_semantics = [#tpu.dimension_semantics<parallel>, #tpu.dimension_semantics<arbitrary>], iteration_bounds = array<i64: 1, 1>, scalar_prefetch = 0 : i64, scratch_operands = 2 : i64, tpu.core_type = #tpu.core_type<tc>, window_params = [{transform_indices = @transform_0, window_bounds = array<i64: 16, 128>}, {transform_indices = @transform_1, window_bounds = array<i64: 16, 128>}, {transform_indices = @transform_2, window_bounds = array<i64: 8, 128>}, {transform_indices = @transform_3, window_bounds = array<i64: 8, 128>}]} {
    %c0_i32 = arith.constant 0 : i32
    %0 = arith.cmpi eq, %arg1, %c0_i32 : i32
    %1 = arith.extui %0 : i1 to i32
    %c0_i32_0 = arith.constant 0 : i32
    %2 = arith.cmpi ne, %1, %c0_i32_0 : i32
    scf.if %2 {
      %cst_15 = arith.constant 0.000000e+00 : f32
      %20 = vector.broadcast %cst_15 : f32 to vector<8x128xf32>
      %c0_16 = arith.constant 0 : index
      %c0_17 = arith.constant 0 : index
      %21 = vector.load %arg6[%c0_16, %c0_17] : memref<8x128xf32, #tpu.memory_space<vmem>>, vector<8x128xf32>
      tpu.vector_store %arg6[%c0_16, %c0_17], %20 {strides = array<i32>} : memref<8x128xf32, #tpu.memory_space<vmem>>, vector<8x128xf32>,
      %cst_18 = arith.constant 0.000000e+00 : f32
      %22 = vector.broadcast %cst_18 : f32 to vector<8x128xf32>
      %c0_19 = arith.constant 0 : index
      %c0_20 = arith.constant 0 : index
      %23 = vector.load %arg7[%c0_19, %c0_20] : memref<8x128xf32, #tpu.memory_space<vmem>>, vector<8x128xf32>
      tpu.vector_store %arg7[%c0_19, %c0_20], %22 {strides = array<i32>} : memref<8x128xf32, #tpu.memory_space<vmem>>, vector<8x128xf32>,
    } else {
    }
    %c0 = arith.constant 0 : index
    %c0_1 = arith.constant 0 : index
    %3 = vector.load %arg2[%c0, %c0_1] : memref<16x128xf32, #tpu.memory_space<vmem>>, vector<16x128xf32>
    %c0_2 = arith.constant 0 : index
    %c0_3 = arith.constant 0 : index
    %4 = vector.load %arg3[%c0_2, %c0_3] : memref<16x128xf32, #tpu.memory_space<vmem>>, vector<16x128xf32>
    %5 = arith.subf %3, %4 : vector<16x128xf32>
    %6 = vector.shape_cast %5 : vector<16x128xf32> to vector<2x8x128xf32>
    %c0_4 = arith.constant 0 : index
    %c0_5 = arith.constant 0 : index
    %7 = vector.load %arg6[%c0_4, %c0_5] : memref<8x128xf32, #tpu.memory_space<vmem>>, vector<8x128xf32>
    %8 = math.absf %6 : vector<2x8x128xf32>
    %cst = arith.constant dense<0.000000e+00> : vector<8x128xf32>
    %9 = vector.multi_reduction <add>, %8, %cst [0] : vector<2x8x128xf32> to vector<8x128xf32>
    %10 = arith.addf %7, %9 : vector<8x128xf32>
    %c0_6 = arith.constant 0 : index
    %c0_7 = arith.constant 0 : index
    %11 = vector.load %arg6[%c0_6, %c0_7] : memref<8x128xf32, #tpu.memory_space<vmem>>, vector<8x128xf32>
    tpu.vector_store %arg6[%c0_6, %c0_7], %10 {strides = array<i32>} : memref<8x128xf32, #tpu.memory_space<vmem>>, vector<8x128xf32>,
    %c0_8 = arith.constant 0 : index
    %c0_9 = arith.constant 0 : index
    %12 = vector.load %arg7[%c0_8, %c0_9] : memref<8x128xf32, #tpu.memory_space<vmem>>, vector<8x128xf32>
    %13 = arith.mulf %6, %6 : vector<2x8x128xf32>
    %cst_10 = arith.constant dense<0.000000e+00> : vector<8x128xf32>
    %14 = vector.multi_reduction <add>, %13, %cst_10 [0] : vector<2x8x128xf32> to vector<8x128xf32>
    %15 = arith.addf %12, %14 : vector<8x128xf32>
    %c0_11 = arith.constant 0 : index
    %c0_12 = arith.constant 0 : index
    %16 = vector.load %arg7[%c0_11, %c0_12] : memref<8x128xf32, #tpu.memory_space<vmem>>, vector<8x128xf32>
    tpu.vector_store %arg7[%c0_11, %c0_12], %15 {strides = array<i32>} : memref<8x128xf32, #tpu.memory_space<vmem>>, vector<8x128xf32>,
    %c0_i32_13 = arith.constant 0 : i32
    %17 = arith.cmpi eq, %arg1, %c0_i32_13 : i32
    %18 = arith.extui %17 : i1 to i32
    %c0_i32_14 = arith.constant 0 : i32
    %19 = arith.cmpi ne, %18, %c0_i32_14 : i32
    scf.if %19 {
      %c0_15 = arith.constant 0 : index
      %c0_16 = arith.constant 0 : index
      %20 = vector.load %arg6[%c0_15, %c0_16] : memref<8x128xf32, #tpu.memory_space<vmem>>, vector<8x128xf32>
      %c0_17 = arith.constant 0 : index
      %c0_18 = arith.constant 0 : index
      %21 = vector.load %arg4[%c0_17, %c0_18] : memref<8x128xf32, #tpu.memory_space<vmem>>, vector<8x128xf32>
      tpu.vector_store %arg4[%c0_17, %c0_18], %20 {strides = array<i32>} : memref<8x128xf32, #tpu.memory_space<vmem>>, vector<8x128xf32>,
      %c0_19 = arith.constant 0 : index
      %c0_20 = arith.constant 0 : index
      %22 = vector.load %arg7[%c0_19, %c0_20] : memref<8x128xf32, #tpu.memory_space<vmem>>, vector<8x128xf32>
      %c0_21 = arith.constant 0 : index
      %c0_22 = arith.constant 0 : index
      %23 = vector.load %arg5[%c0_21, %c0_22] : memref<8x128xf32, #tpu.memory_space<vmem>>, vector<8x128xf32>
      tpu.vector_store %arg5[%c0_21, %c0_22], %22 {strides = array<i32>} : memref<8x128xf32, #tpu.memory_space<vmem>>, vector<8x128xf32>,
    } else {
    }
    return
  }
  func.func @transform_0(%arg0: i32, %arg1: i32) -> (i32, i32) {
    %c1_i32 = arith.constant 1 : i32
    %0 = arith.muli %arg0, %c1_i32 : i32
    %1 = arith.addi %0, %arg1 : i32
    %c0_i32 = arith.constant 0 : i32
    %2 = arith.minsi %1, %c0_i32 : i32
    %c0_i32_0 = arith.constant 0 : i32
    %c0_i32_1 = arith.constant 0 : i32
    return %2, %c0_i32_0 : i32, i32
  }
  func.func @transform_1(%arg0: i32, %arg1: i32) -> (i32, i32) {
    %c1_i32 = arith.constant 1 : i32
    %0 = arith.muli %arg0, %c1_i32 : i32
    %1 = arith.addi %0, %arg1 : i32
    %c0_i32 = arith.constant 0 : i32
    %2 = arith.minsi %1, %c0_i32 : i32
    %c0_i32_0 = arith.constant 0 : i32
    %c0_i32_1 = arith.constant 0 : i32
    return %2, %c0_i32_0 : i32, i32
  }
  func.func @transform_2(%arg0: i32, %arg1: i32) -> (i32, i32) {
    %c0_i32 = arith.constant 0 : i32
    %c0_i32_0 = arith.constant 0 : i32
    return %arg0, %c0_i32 : i32, i32
  }
  func.func @transform_3(%arg0: i32, %arg1: i32) -> (i32, i32) {
    %c0_i32 = arith.constant 0 : i32
    %c0_i32_0 = arith.constant 0 : i32
    return %arg0, %c0_i32 : i32, i32
  }
}

</mosaic_0001>

<bundles_post_ra>
// kernel: tpu_custom_call.1
= control target key start
LH: loop header
LB: loop body
LE: loop exit
PB: predicated region body
PF: predicated region fallthrough
CT: control target
= control target key end

     0   :  { %9 = vsyncpa [#allocation5], 0  ;;  %s284_s0 = inlined_call_operand.hbm [shape: f32[16,128], index: 0, kind: input, shape index: {}]   ;;  %s285_s1 = inlined_call_operand.hbm [shape: f32[16,128], index: 1, kind: input, shape index: {}]   ;;  %s286_s2 = inlined_call_operand.hbm [shape: f32[8,128], index: 2, kind: output, shape index: {0}]   ;;  %s287_s3 = inlined_call_operand.hbm [shape: f32[8,128], index: 3, kind: output, shape index: {1}]  }
   0x1   :  { %10 = vsyncpa [#allocation8], 0 }
   0x2   :  { %11 = vsyncpa [#allocation6], 0 }
   0x3   :  { %12 = vsyncpa [#allocation11], 0  ;;  %s23_s14 = sshll.u32 %s284_s0, 4  ;;  %s246_s15 = smov [#allocation4]   ;;  %s24_s14 = int_to_ptr.hbm [resolvable:$true] %s23_s14 }
   0x4   :  { %s25_s16 = sshll.u32 %s246_s15, 4  ;;  %s42_s19 = sshll.u32 %s285_s1, 4  ;;  %s26_s16 = int_to_ptr.vmem [resolvable:$true] %s25_s16  ;;  %s43_s19 = int_to_ptr.hbm [resolvable:$true] %s42_s19 }
   0x5   :  { %s247_s20 = smov 128   ;;  %s248_s21 = smov 8  }
   0x6   :  { %31 = dma.hbm_to_vmem [thread:$0]  %s24_s14, 256, %s26_s16, [#allocation5], %s247_s20, %s247_s20, %s248_s21  }
   0x7   :  { %s249_s22 = smov [#allocation7]  }
   0x8   :  { %s44_s23 = sshll.u32 %s249_s22, 4  ;;  %s45_s23 = int_to_ptr.vmem [resolvable:$true] %s44_s23 }
   0x9   :  { %50 = dma.hbm_to_vmem [thread:$0]  %s43_s19, 256, %s45_s23, [#allocation8], %s247_s20, %s247_s20, %s248_s21  }
   0xa   :  { %238 = dma.done.wait [#allocation5], 256  }
   0xb   :  { %239 = vsyncadd [#allocation5], 4294967040 }
   0xc   :  { %240 = dma.done.wait [#allocation8], 256  }
   0xd   :  { %241 = vsyncadd [#allocation8], 4294967040  ;;  %v73_v0 = vld [vmem:[#allocation4] sm:$0xff]  ;;  %v74_v1 = vld [vmem:[#allocation4 + $0x8] sm:$0xff]  ;;  %s250_s0 = smov [#allocation9]   ;;  %s105_s26 = sshll.u32 %s286_s2, 4  ;;  %s106_s26 = int_to_ptr.hbm [resolvable:$true] %s105_s26 }
   0xe   :  { %v75_v2 = vld [vmem:[#allocation7] sm:$0xff]  ;;  %v76_v3 = vld [vmem:[#allocation7 + $0x8] sm:$0xff]  ;;  %s103_s1 = sshll.u32 %s250_s0, 4  ;;  %s251_s27 = smov [#allocation10]   ;;  %s104_s1 = int_to_ptr.vmem [resolvable:$true] %s103_s1 }
   0xf   :  { %v77_v4 = vsub.f32 %v73_v0, %v75_v2  ;;  %v78_v5 = vsub.f32 %v74_v1, %v76_v3  ;;  %s114_s28 = sshll.u32 %s251_s27, 4  ;;  %s116_s4 = sshll.u32 %s287_s3, 4  ;;  %s115_s28 = int_to_ptr.vmem [resolvable:$true] %s114_s28  ;;  %s117_s4 = int_to_ptr.hbm [resolvable:$true] %s116_s4 }
  0x11   :  { %v80_v6 = vand.u32 2147483647, %v77_v4  ;;  %v86_v7 = vmul.f32 %v77_v4, %v77_v4  ;;  %v81_v8 = vand.u32 2147483647, %v78_v5  ;;  %v87_v9 = vmul.f32 %v78_v5, %v78_v5 }
  0x13   :  { %v82_v10 = vadd.f32 %v81_v8, %v80_v6  ;;  %v88_v11 = vadd.f32 %v87_v9, %v86_v7 }
  0x15   :  { %95 = vst [vmem:[#allocation9] sm:$0xff] %v82_v10 }
  0x16   :  { %97 = vst [vmem:[#allocation10] sm:$0xff] %v88_v11  ;;  %108 = dma.vmem_to_hbm [thread:$0]  %s104_s1, 128, %s106_s26, [#allocation6]  }
  0x17   :  { %119 = dma.vmem_to_hbm [thread:$0]  %s115_s28, 128, %s117_s4, [#allocation11]  }
  0x18   :  { %242 = dma.done.wait [#allocation6], 128  }
  0x19   :  { %243 = vsyncadd [#allocation6], 4294967168 }
  0x1a   :  { %244 = dma.done.wait [#allocation11], 128  }
  0x1b   :  { %245 = vsyncadd [#allocation11], 4294967168 }
  0x1c   :  { %128 = vsyncpa [#allocation5], 1 }
  0x1d   :  { %129 = vsyncpa [#allocation8], 1 }
  0x1e   :  { %130 = vsyncpa [#allocation6], 1 }
  0x1f   :  { %131 = vsyncpa [#allocation11], 1 }

</bundles_post_ra>
